<compile_context>
chip_gen: v7x
topology: tpu7x:2x2x1
jax: 0.10.0
libtpu: 0.0.40
codegen_flags: <defaults>
</compile_context>

<pallas_src>
import math

import jax
import jax.numpy as jnp
from jax.experimental import pallas as pl
from jax.experimental.pallas import tpu as pltpu


def user_attention_kernel(key_ref, val_ref, mask_ref, watt_ref, expand_ref,
                          reduce_ref, out_ref):
    """One batch tile.

    key_ref    : (BT, K*D)  lane-dense clicked-item embeddings
    val_ref    : (BT, K*C)  lane-dense context-code values
    mask_ref   : (BT, K)    1.0 = keep, 0.0 = masked
    watt_ref   : (K*D, K)   block-diagonal projection  W[j*D+d, j] = att[d]
    expand_ref : (K, K*C)   0/1 expansion              E[j, j*C+c] = 1
    reduce_ref : (K*C, C)   0/1 segment reduction      R[j*C+c, c] = 1
    out_ref    : (BT, C)
    """
    k2d = key_ref[...]                                           # (BT, K*D)
    v2d = val_ref[...].astype(jnp.float32)                       # (BT, K*C)
    m = mask_ref[...]                                            # (BT, K)

    # logits[b, j] = sum_d key[b, j, d] * att[d] — one MXU matmul per tile instead
    # of BT XLU lane-reduces.
    logits = jnp.dot(k2d, watt_ref[...],
                     preferred_element_type=jnp.float32)         # (BT, K)

    # masked_fill_(~mask, 1e-30): masked positions get logit 1e-30 (NOT -inf), so
    # they still receive softmax weight — intentional, faithful to the PyTorch module.
    logits = jnp.where(m > 0.0, logits, jnp.float32(1e-30))

    # Softmax over the num_click axis (lane axis).  Exact divide for parity with
    # the reference.
    mx = jnp.max(logits, axis=-1, keepdims=True)                 # (BT, 1)
    e = jnp.exp(logits - mx)                                     # (BT, K)
    s = jnp.sum(e, axis=-1, keepdims=True)                       # (BT, 1)
    w = e / s                                                    # (BT, K)

    # out[b, c] = sum_j w[b, j] * value[b, j, c], as constant 0/1 matmuls so the
    # sublane<->lane relayout of w and the per-row sublane reduce go to the MXU.
    w_exp = jnp.dot(w, expand_ref[...],
                    preferred_element_type=jnp.float32)          # (BT, K*C)
    out = jnp.dot(w_exp * v2d, reduce_ref[...],
                  preferred_element_type=jnp.float32)            # (BT, C)
    out_ref[...] = out.astype(out_ref.dtype)


def _pick_block_b(B, K, D, C, itemsize,
                  target_bytes=8 * 1024 * 1024,
                  vmem_budget_bytes=40 * 1024 * 1024):
    """Batch-tile size using the *padded* per-row VMEM footprint.

    Every block pads its last dim to a multiple of 128 lanes; the working set is
    double-buffered.  Budget is conservative enough for v7x (64 MiB physical VMEM)
    and loose on v5e/v6e (128 MiB)."""
    def pad128(n):
        return ((n + 127) // 128) * 128

    row_bytes = (pad128(K * D) + pad128(K * C)) * itemsize \
                + (pad128(K) + pad128(C)) * 4                    # mask + out (f32-ish)
    bt_from_target = max(1, target_bytes // row_bytes)
    bt_from_vmem = max(1, vmem_budget_bytes // (2 * row_bytes))  # 2x: double buffering
    bt = min(bt_from_target, bt_from_vmem)

    if B <= bt:
        # A single tile covers the whole batch.  If the batch is large enough, split
        # it so the "parallel" grid axis can feed both v7x TensorCores.
        if B >= 16:
            return max(8, ((B // 2) // 8) * 8)
        return B                                                 # full-batch block
    return max(8, (min(bt, B) // 8) * 8)                         # sublane-aligned


def user_attention(query, key, value, attn_mask, att_matrix):
    """query: (B, N, D) [unused by the reference forward], key: (B, K, D),
    value: (B, K, C), attn_mask: (B, K) bool, att_matrix: (D, 1).
    Returns (B, 1, C), matching the PyTorch module."""
    del query  # unused in the reference forward
    B, K, D = key.shape
    C = value.shape[-1]

    # Free, contiguous row-major reshapes: put K on the lane axis so VMEM tiles and
    # vregs are fully lane-dense (D=32 / C=16 alone waste 75-88% of every vreg).
    key2d = key.reshape(B, K * D)                                # (B, K*D)
    val2d = value.reshape(B, K * C)                              # (B, K*C)
    mask_f = attn_mask.astype(jnp.float32)                       # (B, K)

    # Small constants driving the MXU formulation (a few KiB total).
    w_att = jnp.kron(jnp.eye(K, dtype=jnp.float32),
                     att_matrix.reshape(D, 1).astype(jnp.float32)
                     ).astype(key.dtype)                         # (K*D, K)
    expand = jnp.kron(jnp.eye(K, dtype=jnp.float32),
                      jnp.ones((1, C), jnp.float32))             # (K, K*C)
    reduce_ = jnp.kron(jnp.ones((K, 1), jnp.float32),
                       jnp.eye(C, dtype=jnp.float32))            # (K*C, C)

    itemsize = max(key.dtype.itemsize, value.dtype.itemsize)
    BT = _pick_block_b(B, K, D, C, itemsize)
    grid = (pl.cdiv(B, BT),)

    out2d = pl.pallas_call(
        user_attention_kernel,
        out_shape=jax.ShapeDtypeStruct((B, C), value.dtype),
        grid=grid,
        in_specs=[
            pl.BlockSpec((BT, K * D), lambda b: (b, 0)),         # key, lane-dense
            pl.BlockSpec((BT, K * C), lambda b: (b, 0)),         # value, lane-dense
            pl.BlockSpec((BT, K), lambda b: (b, 0)),             # mask
            pl.BlockSpec((K * D, K), lambda b: (0, 0)),          # att projection (const)
            pl.BlockSpec((K, K * C), lambda b: (0, 0)),          # expand (const)
            pl.BlockSpec((K * C, C), lambda b: (0, 0)),          # segment reduce (const)
        ],
        out_specs=pl.BlockSpec((BT, C), lambda b: (b, 0)),       # lane-dense out slab
        compiler_params=pltpu.CompilerParams(
            dimension_semantics=("parallel",),                   # shard tiles across TCs
            vmem_limit_bytes=48 * 1024 * 1024,                   # safe on v7x, loose elsewhere
        ),
    )(key2d, val2d, mask_f, w_att, expand, reduce_)

    return out2d.reshape(B, 1, C)


def reference_jax(key, value, attn_mask, att_matrix):
    # Pure-JAX reference mirroring the PyTorch module.
    logits = jnp.matmul(key, att_matrix[None])                   # (B, K, 1)
    logits = jnp.transpose(logits, (0, 2, 1))                    # (B, 1, K)
    logits = jnp.where(attn_mask[:, None, :], logits, 1e-30)
    w = jax.nn.softmax(logits, axis=2)
    return jnp.matmul(w, value)                                  # (B, 1, C)


if __name__ == "__main__":
    # Small shapes: batch=2, num_candidates=4, num_click=8, embed_dim=32,
    # num_context_codes=16.
    B, N, K, D, C = 2, 4, 8, 32, 16
    root = jax.random.PRNGKey(0)
    k_q, k_k, k_v, k_m, k_p = jax.random.split(root, 5)

    query = jax.random.normal(k_q, (B, N, D), dtype=jnp.float32)  # unused by forward
    key = jax.random.normal(k_k, (B, K, D), dtype=jnp.float32)
    value = jax.random.normal(k_v, (B, K, C), dtype=jnp.float32)
    attn_mask = jax.random.bernoulli(k_m, 0.7, (B, K))
    attn_mask = attn_mask.at[:, 0].set(True)

    # Deterministic xavier_uniform init for att_matrix (D, 1) with tanh gain (= 5/3).
    gain = 5.0 / 3.0
    bound = gain * math.sqrt(6.0 / (D + 1))
    att_matrix = jax.random.uniform(
        k_p, (D, 1), dtype=jnp.float32, minval=-bound, maxval=bound)

    out = user_attention(query, key, value, attn_mask, att_matrix)
    out = jax.block_until_ready(out)

    ref = reference_jax(key, value, attn_mask, att_matrix)
    if not jnp.allclose(out, ref, atol=1e-4, rtol=1e-4):
        max_err = float(jnp.max(jnp.abs(out - ref)))
        raise AssertionError(
            f"Pallas kernel does not match JAX reference (max abs err {max_err:.3e})")

    print("KERNEL_OK")
</pallas_src>

<mosaic_0001>
module attributes {stable_mosaic.version = 11 : i64} {
  func.func @user_attention_kernel(%arg0: i32, %arg1: memref<2x256xf32, #tpu.memory_space<vmem>>, %arg2: memref<2x128xf32, #tpu.memory_space<vmem>>, %arg3: memref<2x8xf32, #tpu.memory_space<vmem>>, %arg4: memref<256x8xf32, #tpu.memory_space<vmem>>, %arg5: memref<8x128xf32, #tpu.memory_space<vmem>>, %arg6: memref<128x16xf32, #tpu.memory_space<vmem>>, %arg7: memref<2x16xf32, #tpu.memory_space<vmem>>) attributes {dimension_semantics = [#tpu.dimension_semantics<parallel>], iteration_bounds = array<i64: 1>, scalar_prefetch = 0 : i64, scratch_operands = 0 : i64, tpu.core_type = #tpu.core_type<tc>, window_params = [{transform_indices = @transform_0, window_bounds = array<i64: 2, 256>}, {transform_indices = @transform_1, window_bounds = array<i64: 2, 128>}, {transform_indices = @transform_2, window_bounds = array<i64: 2, 8>}, {pipeline_mode = #tpu.pipeline_mode<synchronous>, transform_indices = @transform_3, window_bounds = array<i64: 256, 8>}, {pipeline_mode = #tpu.pipeline_mode<synchronous>, transform_indices = @transform_4, window_bounds = array<i64: 8, 128>}, {pipeline_mode = #tpu.pipeline_mode<synchronous>, transform_indices = @transform_5, window_bounds = array<i64: 128, 16>}, {transform_indices = @transform_6, window_bounds = array<i64: 2, 16>}]} {
    %c0 = arith.constant 0 : index
    %c0_0 = arith.constant 0 : index
    %0 = vector.load %arg1[%c0, %c0_0] : memref<2x256xf32, #tpu.memory_space<vmem>>, vector<2x256xf32>
    %c0_1 = arith.constant 0 : index
    %c0_2 = arith.constant 0 : index
    %1 = vector.load %arg2[%c0_1, %c0_2] : memref<2x128xf32, #tpu.memory_space<vmem>>, vector<2x128xf32>
    %c0_3 = arith.constant 0 : index
    %c0_4 = arith.constant 0 : index
    %2 = vector.load %arg3[%c0_3, %c0_4] : memref<2x8xf32, #tpu.memory_space<vmem>>, vector<2x8xf32>
    %c0_5 = arith.constant 0 : index
    %c0_6 = arith.constant 0 : index
    %3 = vector.load %arg4[%c0_5, %c0_6] : memref<256x8xf32, #tpu.memory_space<vmem>>, vector<256x8xf32>
    %cst = arith.constant dense<0.000000e+00> : vector<2x8xf32>
    %4 = tpu.matmul %0, %3, %cst {dimension_numbers = #tpu.dot_dimension_numbers<[1], [0], [0], [1], [0, 0, 1, 1], [], []>} : vector<2x256xf32>, vector<256x8xf32>, vector<2x8xf32> -> vector<2x8xf32>
    %cst_7 = arith.constant 0.000000e+00 : f32
    %5 = vector.broadcast %cst_7 : f32 to vector<2x8xf32>
    %6 = arith.cmpf ogt, %2, %5 : vector<2x8xf32>
    %cst_8 = arith.constant 1.000000e-30 : f32
    %7 = vector.broadcast %cst_8 : f32 to vector<2x8xf32>
    %8 = arith.select %6, %4, %7 : vector<2x8xi1>, vector<2x8xf32>
    %cst_9 = arith.constant dense<0xFF800000> : vector<2xf32>
    %9 = vector.multi_reduction <maximumf>, %8, %cst_9 [1] : vector<2x8xf32> to vector<2xf32>
    %10 = vector.shape_cast %9 : vector<2xf32> to vector<2x1xf32>
    %11 = vector.broadcast %10 : vector<2x1xf32> to vector<2x8xf32>
    %12 = arith.subf %8, %11 : vector<2x8xf32>
    %13 = math.exp %12 : vector<2x8xf32>
    %cst_10 = arith.constant dense<0.000000e+00> : vector<2xf32>
    %14 = vector.multi_reduction <add>, %13, %cst_10 [1] : vector<2x8xf32> to vector<2xf32>
    %15 = vector.shape_cast %14 : vector<2xf32> to vector<2x1xf32>
    %16 = vector.broadcast %15 : vector<2x1xf32> to vector<2x8xf32>
    %17 = arith.divf %13, %16 : vector<2x8xf32>
    %c0_11 = arith.constant 0 : index
    %c0_12 = arith.constant 0 : index
    %18 = vector.load %arg5[%c0_11, %c0_12] : memref<8x128xf32, #tpu.memory_space<vmem>>, vector<8x128xf32>
    %cst_13 = arith.constant dense<0.000000e+00> : vector<2x128xf32>
    %19 = tpu.matmul %17, %18, %cst_13 {dimension_numbers = #tpu.dot_dimension_numbers<[1], [0], [0], [1], [0, 0, 1, 1], [], []>} : vector<2x8xf32>, vector<8x128xf32>, vector<2x128xf32> -> vector<2x128xf32>
    %20 = arith.mulf %19, %1 : vector<2x128xf32>
    %c0_14 = arith.constant 0 : index
    %c0_15 = arith.constant 0 : index
    %21 = vector.load %arg6[%c0_14, %c0_15] : memref<128x16xf32, #tpu.memory_space<vmem>>, vector<128x16xf32>
    %cst_16 = arith.constant dense<0.000000e+00> : vector<2x16xf32>
    %22 = tpu.matmul %20, %21, %cst_16 {dimension_numbers = #tpu.dot_dimension_numbers<[1], [0], [0], [1], [0, 0, 1, 1], [], []>} : vector<2x128xf32>, vector<128x16xf32>, vector<2x16xf32> -> vector<2x16xf32>
    %c0_17 = arith.constant 0 : index
    %c0_18 = arith.constant 0 : index
    %23 = vector.load %arg7[%c0_17, %c0_18] : memref<2x16xf32, #tpu.memory_space<vmem>>, vector<2x16xf32>
    tpu.vector_store %arg7[%c0_17, %c0_18], %22 {strides = array<i32>} : memref<2x16xf32, #tpu.memory_space<vmem>>, vector<2x16xf32>,
    return
  }
  func.func @transform_0(%arg0: i32) -> (i32, i32) {
    %c0_i32 = arith.constant 0 : i32
    %c0_i32_0 = arith.constant 0 : i32
    return %arg0, %c0_i32 : i32, i32
  }
  func.func @transform_1(%arg0: i32) -> (i32, i32) {
    %c0_i32 = arith.constant 0 : i32
    %c0_i32_0 = arith.constant 0 : i32
    return %arg0, %c0_i32 : i32, i32
  }
  func.func @transform_2(%arg0: i32) -> (i32, i32) {
    %c0_i32 = arith.constant 0 : i32
    %c0_i32_0 = arith.constant 0 : i32
    return %arg0, %c0_i32 : i32, i32
  }
  func.func @transform_3(%arg0: i32) -> (i32, i32) {
    %c0_i32 = arith.constant 0 : i32
    %c0_i32_0 = arith.constant 0 : i32
    %c0_i32_1 = arith.constant 0 : i32
    return %c0_i32, %c0_i32_0 : i32, i32
  }
  func.func @transform_4(%arg0: i32) -> (i32, i32) {
    %c0_i32 = arith.constant 0 : i32
    %c0_i32_0 = arith.constant 0 : i32
    %c0_i32_1 = arith.constant 0 : i32
    return %c0_i32, %c0_i32_0 : i32, i32
  }
  func.func @transform_5(%arg0: i32) -> (i32, i32) {
    %c0_i32 = arith.constant 0 : i32
    %c0_i32_0 = arith.constant 0 : i32
    %c0_i32_1 = arith.constant 0 : i32
    return %c0_i32, %c0_i32_0 : i32, i32
  }
  func.func @transform_6(%arg0: i32) -> (i32, i32) {
    %c0_i32 = arith.constant 0 : i32
    %c0_i32_0 = arith.constant 0 : i32
    return %arg0, %c0_i32 : i32, i32
  }
}

</mosaic_0001>

<bundles_post_ra>
// kernel: tpu_custom_call.1
= control target key start
LH: loop header
LB: loop body
LE: loop exit
PB: predicated region body
PF: predicated region fallthrough
CT: control target
= control target key end

     0   :  { %s725_s0 = inlined_call_operand.vmem [shape: f32[2,256], index: 0, kind: input, shape index: {}]   ;;  %s726_s1 = inlined_call_operand.vmem [shape: f32[2,128], index: 1, kind: input, shape index: {}]   ;;  %s727_s2 = inlined_call_operand.vmem [shape: f32[2,8], index: 2, kind: input, shape index: {}]   ;;  %s728_s3 = inlined_call_operand.vmem [shape: f32[256,8], index: 3, kind: input, shape index: {}]   ;;  %s729_s4 = inlined_call_operand.vmem [shape: f32[8,128], index: 4, kind: input, shape index: {}]   ;;  %s730_s5 = inlined_call_operand.vmem [shape: f32[128,16], index: 5, kind: input, shape index: {}]   ;;  %s731_s6 = inlined_call_operand.hbm [shape: f32[2,16], index: 6, kind: output, shape index: {}]  }
   0x1   :  { %v43_v0 = vld [vmem:[%s728_s3 + $0x80] sm:$0xff]  ;;  %v44_v1 = vld [vmem:[%s728_s3 + $0x88] sm:$0xff]  ;;  %v45_v5 = vld [vmem:[%s728_s3 + $0x90] sm:$0xff] }
   0x2   :  { %v27_v2 = vld [vmem:[%s728_s3] sm:$0xff]  ;;  %v428_v3 = vpack.c.bf16 %v44_v1, %v43_v0  ;;  %v28_v4 = vld [vmem:[%s728_s3 + $0x8] sm:$0xff]  ;;  %v46_v6 = vld [vmem:[%s728_s3 + $0x98] sm:$0xff] }
   0x3   :  { %v430_v7 = vpack.c.bf16 %v28_v4, %v27_v2  ;;  %v432_v8 = vpack.c.bf16 %v46_v6, %v45_v5  ;;  %v29_v9 = vld [vmem:[%s728_s3 + $0x10] sm:$0xff]  ;;  %v30_v10 = vld [vmem:[%s728_s3 + $0x18] sm:$0xff]  ;;  %v47_v11 = vld [vmem:[%s728_s3 + $0xa0] sm:$0xff] }
   0x4   :  { %429 = vmatprep.subr.bf16.mxu0 %v428_v3  ;;  %v48_v12 = vld [vmem:[%s728_s3 + $0xa8] sm:$0xff]  ;;  %v434_v13 = vpack.c.bf16 %v30_v10, %v29_v9  ;;  %v31_v15 = vld [vmem:[%s728_s3 + $0x20] sm:$0xff]  ;;  %v49_v17 = vld [vmem:[%s728_s3 + $0xb0] sm:$0xff] }
   0x5   :  { %431 = vmatpush3.bf16.msra.mxu0 %v430_v7  ;;  %v436_v14 = vpack.c.bf16 %v48_v12, %v47_v11  ;;  %v32_v16 = vld [vmem:[%s728_s3 + $0x28] sm:$0xff]  ;;  %v50_v18 = vld [vmem:[%s728_s3 + $0xb8] sm:$0xff]  ;;  %v33_v21 = vld [vmem:[%s728_s3 + $0x30] sm:$0xff] }
   0x6   :  { %433 = vmatprep.subr.bf16.mxu0 %v432_v8  ;;  %v438_v19 = vpack.c.bf16 %v32_v16, %v31_v15  ;;  %v440_v20 = vpack.c.bf16 %v50_v18, %v49_v17  ;;  %v34_v22 = vld [vmem:[%s728_s3 + $0x38] sm:$0xff]  ;;  %v51_v23 = vld [vmem:[%s728_s3 + $0xc0] sm:$0xff]  ;;  %v52_v24 = vld [vmem:[%s728_s3 + $0xc8] sm:$0xff] }
   0x7   :  { %v332_v25 = vld.sshfl [vmem:[%s725_s0] sm:$0x33 pattern:$0x76325410] }
   0x8   :  { %v67_v26 = vcombine.high %v332_v25, %v332_v25 }
   0x9   :  { %435 = vmatpush3.bf16.msra.mxu0 %v434_v13 }
   0xa   :  { %437 = vmatprep.subr.bf16.mxu0 %v436_v14 }
   0xb   :  { %11 = vsyncpa [#allocation3], 0  ;;  %v442_v27 = vpack.c.bf16 %v34_v22, %v33_v21  ;;  %v444_v28 = vpack.c.bf16 %v52_v24, %v51_v23  ;;  %v35_v29 = vld [vmem:[%s728_s3 + $0x40] sm:$0xff]  ;;  %v36_v30 = vld [vmem:[%s728_s3 + $0x48] sm:$0xff]  ;;  %134 = vmatprep.mubr.f32.mxu0 %v67_v26  ;;  %vm142_vm1 = vcmask 58368   ;;  %v516_v62 = vmov 0.0  }
   0xc   :  { %v53_v31 = vld [vmem:[%s728_s3 + $0xd0] sm:$0xff]  ;;  %v54_v32 = vld [vmem:[%s728_s3 + $0xd8] sm:$0xff]  ;;  %v446_v33 = vpack.c.bf16 %v36_v30, %v35_v29  ;;  %v55_v37 = vld [vmem:[%s728_s3 + $0xe0] sm:$0xff]  ;;  %388 = vmatprep.subr.mxu1 %v516_v62  ;;  %vm517_vm2 = vmmov 0   ;;  %v518_v63 = vmov 0.0|0.0   ;;  %vm155_vm3 = vcmask 64512  }
   0xd   :  { %439 = vmatpush3.bf16.msra.mxu0 %v438_v19  ;;  %v448_v34 = vpack.c.bf16 %v54_v32, %v53_v31  ;;  %v37_v35 = vld [vmem:[%s728_s3 + $0x50] sm:$0xff]  ;;  %v38_v36 = vld [vmem:[%s728_s3 + $0x58] sm:$0xff]  ;;  %v56_v38 = vld [vmem:[%s728_s3 + $0xe8] sm:$0xff]  ;;  %390 = vmatprep.mubr.msk.f32.mxu1 %vm517_vm2, %v516_v62  ;;  %s519_s20 = smov [#allocation2]   ;;  %vm316_vm4 = vcmask 123904  }
   0xe   :  { %441 = vmatprep.subr.bf16.mxu0 %v440_v20  ;;  %v450_v39 = vpack.c.bf16 %v38_v36, %v37_v35  ;;  %v452_v40 = vpack.c.bf16 %v56_v38, %v55_v37  ;;  %v39_v41 = vld [vmem:[%s728_s3 + $0x60] sm:$0xff]  ;;  %v40_v42 = vld [vmem:[%s728_s3 + $0x68] sm:$0xff]  ;;  %v57_v43 = vld [vmem:[%s728_s3 + $0xf0] sm:$0xff]  ;;  %s324_s21 = sshll.u32 %s519_s20, 4  ;;  %s325_s21 = int_to_ptr.vmem [resolvable:$true] %s324_s21 }
   0xf   :  { %v58_v44 = vld [vmem:[%s728_s3 + $0xf8] sm:$0xff]  ;;  %v454_v45 = vpack.c.bf16 %v40_v42, %v39_v41  ;;  %v41_v47 = vld [vmem:[%s728_s3 + $0x70] sm:$0xff]  ;;  %v26_v50 = vld [vmem:[%s727_s2] sm:$0x3]  ;;  %s492_s22 = scalar_lea.vmem %s325_s21, 32  ;;  %p497_p1 = scmp.lt.s32.totalorder %s325_s21, %s325_s21 }
  0x10   :  { %v456_v46 = vpack.c.bf16 %v58_v44, %v57_v43  ;;  %v42_v48 = vld [vmem:[%s728_s3 + $0x78] sm:$0xff]  ;;  %vm140_vm0 = vcmp.gt.f32.partialorder %v26_v50, 0.0  ;;  %v154_v61 = vld [vmem:[%s729_s4] sm:$0xff]  ;;  %v231_v2 = vld [vmem:[%s730_s5 + $0x8] sm:$0xff]  ;;  %p493_p0 = scmp.ne.s32.totalorder %s325_s21, %s492_s22  ;;  %p498_p2 = scmp.lt.s32.totalorder %s492_s22, %s492_s22 }
  0x11   :  { %443 = vmatpush3.bf16.msra.mxu0 %v442_v27  ;;  %v458_v49 = vpack.c.bf16 %v42_v48, %v41_v47  ;;  %389 = vmatpush3.msra.mxu1 %v154_v61  ;;  %v230_v1 = vld [vmem:[%s730_s5] sm:$0xff]  ;;  %v232_v6 = vld [vmem:[%s730_s5 + $0x10] sm:$0xff]  ;;  %v233_v7 = vld [vmem:[%s730_s5 + $0x18] sm:$0xff] }
  0x12   :  { %445 = vmatprep.subr.bf16.mxu0 %v444_v28  ;;  %460 = vmatprep.subr.bf16.mxu1 %v518_v63  ;;  %v461_v4 = vpack.c.bf16 %v231_v2, %v230_v1  ;;  %v464_v8 = vpack.c.bf16 %v233_v7, %v232_v6  ;;  %v234_v9 = vld [vmem:[%s730_s5 + $0x20] sm:$0xff]  ;;  %v235_v10 = vld [vmem:[%s730_s5 + $0x28] sm:$0xff]  ;;  %v236_v12 = vld [vmem:[%s730_s5 + $0x30] sm:$0xff]  ;;  %p499_p3 = por %p498_p2, %p497_p1 }
  0x13   :  { %v467_v11 = vpack.c.bf16 %v235_v10, %v234_v9  ;;  %v237_v13 = vld [vmem:[%s730_s5 + $0x38] sm:$0xff]  ;;  %v238_v15 = vld [vmem:[%s730_s5 + $0x40] sm:$0xff]  ;;  %v239_v16 = vld [vmem:[%s730_s5 + $0x48] sm:$0xff] }
  0x14   :  { %v470_v14 = vpack.c.bf16 %v237_v13, %v236_v12  ;;  %v473_v17 = vpack.c.bf16 %v239_v16, %v238_v15  ;;  %v240_v18 = vld [vmem:[%s730_s5 + $0x50] sm:$0xff]  ;;  %v241_v19 = vld [vmem:[%s730_s5 + $0x58] sm:$0xff]  ;;  %v242_v21 = vld [vmem:[%s730_s5 + $0x60] sm:$0xff]  ;;  %p500_p4 = pnand %p499_p3, %p493_p0 }
  0x15   :  { %447 = vmatpush3.bf16.msra.mxu0 %v446_v33  ;;  %v476_v20 = vpack.c.bf16 %v241_v19, %v240_v18  ;;  %v243_v22 = vld [vmem:[%s730_s5 + $0x68] sm:$0xff]  ;;  %v244_v24 = vld [vmem:[%s730_s5 + $0x70] sm:$0xff]  ;;  %v25_v27 = vld [vmem:[%s726_s1] sm:$0x3] }
  0x16   :  { %449 = vmatprep.subr.bf16.mxu0 %v448_v34  ;;  %v479_v23 = vpack.c.bf16 %v243_v22, %v242_v21 }
  0x19   :  { %451 = vmatpush3.bf16.msra.mxu0 %v450_v39 }
  0x1a   :  { %453 = vmatprep.subr.bf16.mxu0 %v452_v40 }
  0x1d   :  { %455 = vmatpush3.bf16.msra.mxu0 %v454_v45 }
  0x1e   :  { %457 = vmatprep.subr.bf16.mxu0 %v456_v46 }
  0x21   :  { %459 = vmatpush3.bf16.msra.mxu0 %v458_v49 }
  0x24   :  { %135 = vmatmul.mubr.f32.vlgmr.msra.gmra.mrb[0].mxu0 %v332_v25  ;;  %v245_v25 = vld [vmem:[%s730_s5 + $0x78] sm:$0xff] }
  0x25   :  { %v482_v26 = vpack.c.bf16 %v245_v25, %v244_v24 }
  0xf7   :  { %v366_v51 = vpop.f32.mrb[0].mxu0 }
  0xf8   :  { %v367_v52 = vpop.f32.mrb[1].mxu0 }
  0xf9   :  { %v368_v53 = vadd.f32 %v367_v52, %v366_v51 }
  0xfb   :  { %v141_v54 = vsel %vm140_vm0, %v368_v53, 1e-30 }
  0xfc   :  { %v143_v55 = vsel %vm142_vm1, %v141_v54, -inf }
  0xfd   :  { %144 = vmax.xlane.f32.xlu0 %v143_v55 }
 0x18a   :  { %v145_v56 = vpop.xlane.xlu0 %144 }
 0x18b   :  { %v146_v57 = vsub.f32 %v141_v54, %v145_v56 }
 0x18d   :  { %v147_v58 = vmul.f32 1.442695, %v146_v57 }
 0x18f   :  { %488 = vpow2.f32 %v147_v58 }
 0x199   :  { %v489_v59 = vpop.eup %488 }
 0x19a   :  { %v149_v60 = vsel %vm142_vm1, %v489_v59, 0.0 }
 0x19b   :  { %150 = vadd.xlane.f32.xlu0 %v149_v60 }
 0x228   :  { %v151_v0 = vpop.xlane.xlu0 %150 }
 0x229   :  { %490 = vrcp.f32 %v151_v0 }
 0x233   :  { %v491_v3 = vpop.eup %490 }
 0x234   :  { %v153_v5 = vmul.f32 %v491_v3, %v489_v59 }
 0x236   :  { %391 = vmatmul.mubr.msk.f32.vlgmr.msra.gmra.mrb[0].mxu1 %vm155_vm3, %v153_v5 }
 0x237   :  { %462 = vmatpush3.bf16.msra.mxu1 %v461_v4  ;;  %425 = vmatprep.mubr.msk.f32.mxu1 %vm517_vm2, %v516_v62 }
 0x238   :  { %463 = vmatprep.subr.bf16.mxu1 %v518_v63 }
 0x23b   :  { %465 = vmatpush3.bf16.msra.mxu1 %v464_v8 }
 0x23c   :  { %466 = vmatprep.subr.bf16.mxu1 %v518_v63 }
 0x23f   :  { %468 = vmatpush3.bf16.msra.mxu1 %v467_v11 }
 0x240   :  { %469 = vmatprep.subr.bf16.mxu1 %v518_v63 }
 0x243   :  { %471 = vmatpush3.bf16.msra.mxu1 %v470_v14 }
 0x244   :  { %472 = vmatprep.subr.bf16.mxu1 %v518_v63 }
 0x247   :  { %474 = vmatpush3.bf16.msra.mxu1 %v473_v17 }
 0x248   :  { %475 = vmatprep.subr.bf16.mxu1 %v518_v63 }
 0x24b   :  { %477 = vmatpush3.bf16.msra.mxu1 %v476_v20 }
 0x24c   :  { %478 = vmatprep.subr.bf16.mxu1 %v518_v63 }
 0x24f   :  { %480 = vmatpush3.bf16.msra.mxu1 %v479_v23 }
 0x250   :  { %481 = vmatprep.subr.bf16.mxu1 %v518_v63 }
 0x253   :  { %483 = vmatpush3.bf16.msra.mxu1 %v482_v26 }
 0x309   :  { %v225_v28 = vpop.f32.mrb[0].mxu1 }
 0x30a   :  { %v229_v29 = vmul.f32 %v225_v28, %v25_v27  ;;  %v392_v30 = vpop.f32.mrb[1].mxu1 }
 0x30c   :  { %426 = vmatmul.mubr.f32.vlgmr.msra.gmra.mrb[2].mxu1 %v229_v29 }
 0x3df   :  { %v312_v31 = vpop.f32.mrb[2].mxu1 }
 0x3e0   :  { %317 = vst.msk [vmem:[#allocation2] sm:$0x3] %vm316_vm4, %v312_v31  ;;  %v427_v32 = vpop.f32.mrb[3].mxu1 }
 0x3e1   :  { %503 = shalt.err (!%p500_p4)
}
 0x3e2   :  { %s504_s23 = scalar_lea.hbm %s731_s6, 32 }
 0x3e3   :  { %p505_p5 = scmp.ne.s32.totalorder %s731_s6, %s504_s23  ;;  %p508_p6 = scmp.lt.u32.totalorder %s504_s23, %s731_s6 }
 0x3e5   :  { %p510_p7 = pnand %p508_p6, %p505_p5 }
 0x3e7   :  { %513 = shalt.err (!%p510_p7)
}
 0x3e8   :  { %327 = dma.vmem_to_hbm [thread:$0]  %s325_s21, 32, %s731_s6, [#allocation3]  }
 0x3e9   :  { %514 = dma.done.wait [#allocation3], 32  }
 0x3ea   :  { %515 = vsyncadd [#allocation3], 4294967264 }
 0x3eb   :  { %331 = vsyncpa [#allocation3], 1 }

</bundles_post_ra>
